<compile_context>
chip_gen: v7x
topology: tpu7x:2x2x1
jax: 0.10.0
libtpu: 0.0.40
codegen_flags: <defaults>
</compile_context>

<pallas_src>
import functools

import jax
import jax.numpy as jnp
from jax import lax
from jax.experimental import pallas as pl
from jax.experimental.pallas import tpu as pltpu


def _round_up(x, m):
    return (x + m - 1) // m * m


# ---------------------------------------------------------------------------
# obb -> deformable-conv offset field (cheap elementwise glue, plain JAX).
# Mirrors S2ANet-style AlignConv `obb2offset`.
# TODO(synk): the reference obb2offset body is truncated; `corner`/`center_offset` are
# interpreted as: corner=True means box centers are already in corner-origin feature
# coords (else shift by 0.5 px), center_offset shifts the regular conv grid.
# ---------------------------------------------------------------------------
def _obb2offset(obb, stride, kernel_size, kx, ky, corner, center_offset):
    """Returns (dy, dx), each (N, H, W, KK): per-tap deformable-conv offsets."""
    N, _, H, W = obb.shape
    obb = jnp.transpose(obb, (0, 2, 3, 1))  # (N, H, W, 5)
    x_ctr, y_ctr, bw, bh, ang = (obb[..., i] for i in range(5))

    x_ctr = x_ctr / stride
    y_ctr = y_ctr / stride
    bw = bw / stride
    bh = bh / stride
    if not corner:
        x_ctr = x_ctr - 0.5
        y_ctr = y_ctr - 0.5

    cos_a, sin_a = jnp.cos(ang), jnp.sin(ang)
    dw = bw / kernel_size
    dh = bh / kernel_size

    xk = dw[..., None] * kx                       # (N, H, W, KK)
    yk = dh[..., None] * ky
    xr = cos_a[..., None] * xk - sin_a[..., None] * yk
    yr = sin_a[..., None] * xk + cos_a[..., None] * yk
    x_anchor = xr + x_ctr[..., None]
    y_anchor = yr + y_ctr[..., None]

    yc, xc = jnp.meshgrid(jnp.arange(H, dtype=jnp.float32),
                          jnp.arange(W, dtype=jnp.float32), indexing="ij")
    x_conv = xc[None, :, :, None] + center_offset + kx    # (1, H, W, KK)
    y_conv = yc[None, :, :, None] + center_offset + ky

    return y_anchor - y_conv, x_anchor - x_conv


# ---------------------------------------------------------------------------
# Pixel-major bilinear im2col.  4 weighted ROW gathers (Cin contiguous in lanes),
# zero contribution for out-of-bounds corners (mmcv DeformConv zero-padding).
# Returns cols (N, p_pad, k_pad) with contraction index kk*Cin + c, already in
# `out_dtype` (bf16 for the kernel path) — no separate staging/cast copy.
# TODO(synk): fold the 4-corner gather into the Pallas kernel via manual DMA once
# Mosaic dynamic lane-gather is production-ready (removes the cols HBM round-trip).
# ---------------------------------------------------------------------------
def _bilinear_im2col(x, dy, dx, kx, ky, kernel_size, *, k_pad=None, p_pad=None,
                     out_dtype=jnp.float32):
    N, Cin, H, W = x.shape
    KK = kernel_size * kernel_size
    P = H * W
    K = KK * Cin

    # Pixel-major view of x: row gather keeps channels contiguous.
    x_pm = jnp.transpose(x, (0, 2, 3, 1)).reshape(N, P, Cin)

    iy = jnp.arange(H, dtype=jnp.float32)
    ix = jnp.arange(W, dtype=jnp.float32)
    sy = (iy[None, :, None, None] + ky + dy).reshape(N, P, KK)
    sx = (ix[None, None, :, None] + kx + dx).reshape(N, P, KK)
    # Clamp so garbage boxes cannot overflow the int32 floor; anything outside
    # [-1, H] / [-1, W] contributes zero anyway and clamping preserves that.
    sy = jnp.clip(sy, -2.0, H + 1.0)
    sx = jnp.clip(sx, -2.0, W + 1.0)

    y0f = jnp.floor(sy)
    x0f = jnp.floor(sx)
    ly = sy - y0f
    lx = sx - x0f
    y0 = y0f.astype(jnp.int32)
    x0 = x0f.astype(jnp.int32)

    def corner(yi, xi, wgt):
        valid = (yi >= 0) & (yi < H) & (xi >= 0) & (xi < W)
        wgt = jnp.where(valid, wgt, 0.0)                                  # (N, P, KK)
        q = jnp.clip(yi, 0, H - 1) * W + jnp.clip(xi, 0, W - 1)           # flat pixel idx
        g = jnp.take_along_axis(x_pm, q.reshape(N, P * KK, 1), axis=1)    # (N, P*KK, Cin)
        return g.reshape(N, P, KK, Cin) * wgt[..., None]

    cols = (corner(y0,     x0,     (1.0 - ly) * (1.0 - lx))
            + corner(y0,     x0 + 1, (1.0 - ly) * lx)
            + corner(y0 + 1, x0,     ly * (1.0 - lx))
            + corner(y0 + 1, x0 + 1, ly * lx))                            # (N, P, KK, Cin)

    cols = cols.reshape(N, P, K).astype(out_dtype)
    if k_pad is not None or p_pad is not None:
        k_pad = K if k_pad is None else k_pad
        p_pad = P if p_pad is None else p_pad
        cols = jnp.pad(cols, ((0, 0), (0, p_pad - P), (0, k_pad - K)))
    return cols


# ---------------------------------------------------------------------------
# Generation-aware tile planning for the GEMM.
# ---------------------------------------------------------------------------
def _plan_gemm_tiles(K, Cout, P):
    K_p = _round_up(K, 128)       # contraction dim: lane dim of the cols tile
    Cout_p = _round_up(Cout, 128)  # output lane dim: 128-multiple -> unmasked vst

    try:
        vmem_cap = int(pltpu.get_tpu_info().vmem_capacity_bytes)
    except Exception:  # no TPU info available at trace time -> assume v7x (64 MiB)
        vmem_cap = 64 << 20
    budget = min(vmem_cap * 3 // 4, 96 << 20)   # v7x: ~48 MiB, v5e/v6e: 96 MiB

    def tile_bytes(tp):
        return (2 * tp * K_p * 2        # double-buffered cols tile (bf16)
                + 2 * tp * Cout_p * 4   # double-buffered out tile (f32)
                + 2 * K_p * Cout_p * 2)  # weight block (default double-buffered)

    p16 = _round_up(P, 16)
    TP = 16
    for t in (2048, 1024, 512, 256, 128, 64, 32, 16):
        if t <= p16 and tile_bytes(t) <= budget:
            TP = t
            break
    P_pad = _round_up(P, TP)   # pad P to a multiple of TP: never fall back to tiny tiles
    vmem_limit = int(min(budget, max(4 * tile_bytes(TP), 8 << 20)))
    return K_p, Cout_p, TP, P_pad, vmem_limit


# ---------------------------------------------------------------------------
# Pallas kernel: one merged MXU matmul per (batch, pixel-tile) block.
#   cols_ref: (1, TP, K_p)     bf16   (pixel tile, K in lanes)
#   w_ref   : (K_p, Cout_p)    bf16   (shared weight block)
#   o_ref   : (1, TP, Cout_p)  f32    (lane-dense output tile)
# ---------------------------------------------------------------------------
def _deform_gemm_kernel(cols_ref, w_ref, o_ref):
    o_ref[0] = jnp.dot(cols_ref[0], w_ref[...],
                       preferred_element_type=jnp.float32)


def _deform_gemm(cols_p, w_p, *, TP, vmem_limit):
    """cols_p (N, P_pad, K_p) bf16, w_p (K_p, Cout_p) bf16 -> (N, P_pad, Cout_p) f32."""
    N, P_pad, K_p = cols_p.shape
    Cout_p = w_p.shape[1]

    cost = pl.CostEstimate(
        flops=int(2 * N * P_pad * K_p * Cout_p),
        transcendentals=0,
        bytes_accessed=int(cols_p.size * 2 + w_p.size * 2 + N * P_pad * Cout_p * 4))

    # TODO(synk): single-buffer the constant weight block (pipeline_mode=pl.Buffered(1))
    # and deepen cols buffering on v5e once pipeline_mode is verified on the target build.
    return pl.pallas_call(
        _deform_gemm_kernel,
        out_shape=jax.ShapeDtypeStruct((N, P_pad, Cout_p), jnp.float32),
        grid_spec=pltpu.PrefetchScalarGridSpec(
            num_scalar_prefetch=0,
            grid=(N, P_pad // TP),
            in_specs=[
                pl.BlockSpec((1, TP, K_p), lambda n, p: (n, p, 0)),
                pl.BlockSpec((K_p, Cout_p), lambda n, p: (0, 0)),
            ],
            out_specs=pl.BlockSpec((1, TP, Cout_p), lambda n, p: (n, p, 0)),
        ),
        compiler_params=pltpu.CompilerParams(
            dimension_semantics=("parallel", "parallel"),
            vmem_limit_bytes=vmem_limit),
        cost_estimate=cost,
    )(cols_p, w_p)


# ---------------------------------------------------------------------------
# Wrapper == OBBAlignConv.forward (obb path: offsets.size(1) == 5)
# ---------------------------------------------------------------------------
def obb_align_conv(x, obb, weight, *, stride, kernel_size=3, corner=True,
                   center_offset=0.0):
    assert kernel_size > 1 and kernel_size % 2 == 1
    N, Cin, H, W = x.shape
    Cout = weight.shape[0]
    KK = kernel_size * kernel_size
    pad = kernel_size // 2
    P = H * W
    K = KK * Cin

    # register_buffer xx / yy equivalents (row-major over (ky, kx)).
    ky = jnp.asarray([float(i // kernel_size - pad) for i in range(KK)], jnp.float32)
    kx = jnp.asarray([float(i % kernel_size - pad) for i in range(KK)], jnp.float32)

    # offsets = self.obb2offset(offsets.detach(), stride)
    dy, dx = _obb2offset(obb.astype(jnp.float32), float(stride), kernel_size,
                         kx, ky, corner, center_offset)
    dy = lax.stop_gradient(dy)
    dx = lax.stop_gradient(dx)

    K_p, Cout_p, TP, P_pad, vmem_limit = _plan_gemm_tiles(K, Cout, P)

    # Bilinear im2col emitted directly in bf16, padded to the GEMM tile grain.
    cols_p = _bilinear_im2col(x.astype(jnp.float32), dy, dx, kx, ky, kernel_size,
                              k_pad=K_p, p_pad=P_pad, out_dtype=jnp.bfloat16)

    # (Cout, Cin, k, k) -> (K, Cout) with row index kk*Cin + c (matches cols layout).
    w2 = jnp.transpose(weight.reshape(Cout, Cin, KK), (2, 1, 0)).reshape(K, Cout)
    w_p = jnp.zeros((K_p, Cout_p), jnp.bfloat16).at[:K, :Cout].set(
        w2.astype(jnp.bfloat16))

    out = _deform_gemm(cols_p, w_p, TP=TP, vmem_limit=vmem_limit)  # (N, P_pad, Cout_p)
    # Slice only when padding was actually required (no-op for Cout multiples of 128
    # and P multiples of TP), then one NHWC -> NCHW transpose.
    if P_pad != P or Cout_p != Cout:
        out = out[:, :P, :Cout]
    return jnp.transpose(out.reshape(N, H, W, Cout), (0, 3, 1, 2))


if __name__ == "__main__":
    key = jax.random.PRNGKey(0)
    N, Cin, Cout, H, W = 2, 4, 8, 16, 16
    ks, stride = 3, 8

    k1, k2, k3, k4, k5, k6 = jax.random.split(key, 6)
    x = jax.random.normal(k1, (N, Cin, H, W), jnp.float32)

    # Plausible oriented boxes (image coords): centers near pixel centers,
    # sizes a few strides wide, modest rotation angles.
    yc, xc = jnp.meshgrid(jnp.arange(H, dtype=jnp.float32),
                          jnp.arange(W, dtype=jnp.float32), indexing="ij")
    cx = (xc[None] + 0.5) * stride + 2.0 * jax.random.normal(k2, (N, H, W))
    cy = (yc[None] + 0.5) * stride + 2.0 * jax.random.normal(k3, (N, H, W))
    wh = jax.random.uniform(k4, (N, 2, H, W),
                            minval=2.0 * stride, maxval=6.0 * stride)
    ang = jax.random.uniform(k5, (N, H, W), minval=-0.5, maxval=0.5)
    obb = jnp.stack([cx, cy, wh[:, 0], wh[:, 1], ang], axis=1)   # (N, 5, H, W)

    weight = 0.1 * jax.random.normal(k6, (Cout, Cin, ks, ks), jnp.float32)

    fwd = jax.jit(functools.partial(obb_align_conv, stride=stride,
                                    kernel_size=ks, corner=True, center_offset=0.0))
    out = fwd(x, obb, weight)
    jax.block_until_ready(out)
    assert out.shape == (N, Cout, H, W) and out.dtype == jnp.float32

    # Correctness check of the Pallas GEMM path against a pure-JAX f32 reference built
    # from the same offsets (loose tolerance: kernel feeds bf16 operands to the MXU).
    KK = ks * ks
    pad = ks // 2
    ky = jnp.asarray([float(i // ks - pad) for i in range(KK)], jnp.float32)
    kx = jnp.asarray([float(i % ks - pad) for i in range(KK)], jnp.float32)
    dy_r, dx_r = _obb2offset(obb, float(stride), ks, kx, ky, True, 0.0)
    cols_r = _bilinear_im2col(x, dy_r, dx_r, kx, ky, ks)                  # (N, P, K) f32
    w2_r = jnp.transpose(weight.reshape(Cout, Cin, KK), (2, 1, 0)).reshape(KK * Cin, Cout)
    ref = jnp.einsum("npk,ko->npo", cols_r, w2_r)
    ref = jnp.transpose(ref.reshape(N, H, W, Cout), (0, 3, 1, 2))
    assert bool(jnp.allclose(out, ref, atol=5e-2, rtol=5e-2)), "mismatch vs reference"

    print("KERNEL_OK")
</pallas_src>

<mosaic_0001>
module attributes {stable_mosaic.version = 11 : i64} {
  func.func @_deform_gemm_kernel(%arg0: i32, %arg1: i32, %arg2: memref<1x256x128xbf16, #tpu.memory_space<vmem>>, %arg3: memref<128x128xbf16, #tpu.memory_space<vmem>>, %arg4: memref<1x256x128xf32, #tpu.memory_space<vmem>>) attributes {dimension_semantics = [#tpu.dimension_semantics<parallel>, #tpu.dimension_semantics<parallel>], iteration_bounds = array<i64: 2, 1>, scalar_prefetch = 0 : i64, scratch_operands = 0 : i64, tpu.core_type = #tpu.core_type<tc>, window_params = [{transform_indices = @transform_0, window_bounds = array<i64: 1, 256, 128>}, {pipeline_mode = #tpu.pipeline_mode<synchronous>, transform_indices = @transform_1, window_bounds = array<i64: 128, 128>}, {transform_indices = @transform_2, window_bounds = array<i64: 1, 256, 128>}]} {
    %c0 = arith.constant 0 : index
    %c0_0 = arith.constant 0 : index
    %c0_1 = arith.constant 0 : index
    %0 = vector.load %arg2[%c0, %c0_0, %c0_1] : memref<1x256x128xbf16, #tpu.memory_space<vmem>>, vector<1x256x128xbf16>
    %1 = vector.shape_cast %0 : vector<1x256x128xbf16> to vector<256x128xbf16>
    %c0_2 = arith.constant 0 : index
    %c0_3 = arith.constant 0 : index
    %2 = vector.load %arg3[%c0_2, %c0_3] : memref<128x128xbf16, #tpu.memory_space<vmem>>, vector<128x128xbf16>
    %cst = arith.constant dense<0.000000e+00> : vector<256x128xf32>
    %3 = tpu.matmul %1, %2, %cst {dimension_numbers = #tpu.dot_dimension_numbers<[1], [0], [0], [1], [0, 0, 1, 1], [], []>} : vector<256x128xbf16>, vector<128x128xbf16>, vector<256x128xf32> -> vector<256x128xf32>
    %c0_4 = arith.constant 0 : index
    %c0_5 = arith.constant 0 : index
    %c0_6 = arith.constant 0 : index
    %4 = vector.load %arg4[%c0_4, %c0_5, %c0_6] : memref<1x256x128xf32, #tpu.memory_space<vmem>>, vector<1x256x128xf32>
    %5 = vector.shape_cast %4 : vector<1x256x128xf32> to vector<256x128xf32>
    %6 = vector.shape_cast %3 : vector<256x128xf32> to vector<1x256x128xf32>
    tpu.vector_store %arg4[%c0_4, %c0_5, %c0_6], %6 {strides = array<i32>} : memref<1x256x128xf32, #tpu.memory_space<vmem>>, vector<1x256x128xf32>,
    return
  }
  func.func @transform_0(%arg0: i32, %arg1: i32) -> (i32, i32, i32) {
    %c0_i32 = arith.constant 0 : i32
    %c0_i32_0 = arith.constant 0 : i32
    return %arg0, %arg1, %c0_i32 : i32, i32, i32
  }
  func.func @transform_1(%arg0: i32, %arg1: i32) -> (i32, i32) {
    %c0_i32 = arith.constant 0 : i32
    %c0_i32_0 = arith.constant 0 : i32
    %c0_i32_1 = arith.constant 0 : i32
    return %c0_i32, %c0_i32_0 : i32, i32
  }
  func.func @transform_2(%arg0: i32, %arg1: i32) -> (i32, i32, i32) {
    %c0_i32 = arith.constant 0 : i32
    %c0_i32_0 = arith.constant 0 : i32
    return %arg0, %arg1, %c0_i32 : i32, i32, i32
  }
}

</mosaic_0001>

<bundles_post_ra>
// kernel: obb_align_conv.1
= control target key start
LH: loop header
LB: loop body
LE: loop exit
PB: predicated region body
PF: predicated region fallthrough
CT: control target
= control target key end

     0   :  { %s868_s9 = smov 0   ;;  %s870_s10 = smov 0   ;;  %s981_s0 = inlined_call_operand.vmem [shape: bf16[2,256,128], index: 0, kind: input, shape index: {}]   ;;  %s982_s1 = inlined_call_operand.vmem [shape: bf16[128,128], index: 1, kind: input, shape index: {}]   ;;  %s983_s2 = inlined_call_operand.vmem [shape: f32[2,256,128], index: 2, kind: output, shape index: {}]  }
   0x1   :  { %s872_s11 = smov 0  }
   0x2 LB: > { %s24_s12 = sadd.s32 1, %s847_s10  ;;  %p660_p0 = scmp.ge.s32.totalorder %s851_s11, 1  ;;  %s851_s11 = sphi %s872_s11, %s12_s11   ;;  %s847_s10 = sphi %s870_s10, %s985_s10   ;;  %s843_s9 = sphi %s868_s9, %s984_s9  }
   0x3   : > { %p26_p1 = scmp.ge.s32.totalorder %s24_s12, 2  ;;  %p133_p2 = scmp.lt.s32.totalorder %s851_s11, 3 }
   0x5   : > { %s987_s12 = smov (%p26_p1, %s24_s12), 0  ;;  %p134_p3 = pnand %p660_p0, %p133_p2 }
   0x6   : > { %v805_v0 = vld [vmem:[%s982_s1] sm:$0xff] (!%p134_p3)   ;;  %p164_p4 = scmp.lt.s32.totalorder (!%p134_p3), %s843_s9, 1  ;;  %v806_v1 = vld [vmem:[%s982_s1 + $0x8] sm:$0xff] (!%p134_p3)   ;;  %v807_v2 = vld [vmem:[%s982_s1 + $0x10] sm:$0xff] (!%p134_p3)  }
   0x7   : > { %137 = sbr.rel (%p134_p3) target bundleno = 279 (0x117), region = 28  ;;  %717 = vmatprep.subr.bf16.mxu0 (!%p134_p3), %v805_v0  ;;  %765 = vmatprep.subr.bf16.mxu1 (!%p134_p3), %v805_v0  ;;  %v808_v3 = vld [vmem:[%s982_s1 + $0x18] sm:$0xff] (!%p134_p3)   ;;  %v809_v6 = vld [vmem:[%s982_s1 + $0x20] sm:$0xff] (!%p134_p3)   ;;  %v810_v7 = vld [vmem:[%s982_s1 + $0x28] sm:$0xff] (!%p134_p3)  }
   0x8   : > { %718 = vmatpush3.bf16.msra.mxu0 (!%p134_p3), %v805_v0  ;;  %773 = vmatpush3.bf16.msra.mxu1 (!%p134_p3), %v805_v0  ;;  %v811_v8 = vld [vmem:[%s982_s1 + $0x30] sm:$0xff] (!%p134_p3)   ;;  %v812_v9 = vld [vmem:[%s982_s1 + $0x38] sm:$0xff] (!%p134_p3)  }
   0x9   : > { %719 = vmatprep.subr.bf16.mxu0 (!%p134_p3), %v806_v1  ;;  %766 = vmatprep.subr.bf16.mxu1 (!%p134_p3), %v806_v1 }
   0xc   : > { %720 = vmatpush3.bf16.msra.mxu0 (!%p134_p3), %v806_v1  ;;  %774 = vmatpush3.bf16.msra.mxu1 (!%p134_p3), %v806_v1 }
   0xd   : > { %721 = vmatprep.subr.bf16.mxu0 (!%p134_p3), %v807_v2  ;;  %767 = vmatprep.subr.bf16.mxu1 (!%p134_p3), %v807_v2 }
   0xe   : > { %s989_s9 = smov (!%p164_p4, %s843_s9), 1 }
   0xf   : > { %s691_s19 = sshll.u32 %s989_s9, 7  ;;  %s692_s5 = sshll.u32 %s989_s9, 8 }
  0x10   : > { %s901_s22 = scalar_lea.vmem %s981_s0, %s691_s19  ;;  %722 = vmatpush3.bf16.msra.mxu0 %v807_v2  ;;  %775 = vmatpush3.bf16.msra.mxu1 %v807_v2  ;;  %s938_s8 = scalar_lea.vmem %s983_s2, %s692_s5 }
  0x11   : > { %v813_v4 = vld [vmem:[%s901_s22] sm:$0xff]   ;;  %723 = vmatprep.subr.bf16.mxu0 %v808_v3  ;;  %768 = vmatprep.subr.bf16.mxu1 %v808_v3  ;;  %v815_v10 = vld [vmem:[%s901_s22 + $0x8] sm:$0xff]   ;;  %v817_v12 = vld [vmem:[%s901_s22 + $0x10] sm:$0xff]  }
  0x12   : > { %v814_v5 = vld [vmem:[%s901_s22 + $0x40] sm:$0xff]   ;;  %733 = vmatprep.mubr.bf16.mxu0 %v813_v4  ;;  %v816_v11 = vld [vmem:[%s901_s22 + $0x48] sm:$0xff]   ;;  %v818_v13 = vld [vmem:[%s901_s22 + $0x50] sm:$0xff]  }
  0x13   : > { %749 = vmatprep.mubr.bf16.mxu1 %v814_v5  ;;  %v819_v14 = vld [vmem:[%s901_s22 + $0x18] sm:$0xff]   ;;  %v821_v16 = vld [vmem:[%s901_s22 + $0x20] sm:$0xff]   ;;  %v823_v18 = vld [vmem:[%s901_s22 + $0x28] sm:$0xff]  }
  0x14   : > { %724 = vmatpush3.bf16.msra.mxu0 %v808_v3  ;;  %776 = vmatpush3.bf16.msra.mxu1 %v808_v3  ;;  %v820_v15 = vld [vmem:[%s901_s22 + $0x58] sm:$0xff]   ;;  %v822_v17 = vld [vmem:[%s901_s22 + $0x60] sm:$0xff]   ;;  %v824_v19 = vld [vmem:[%s901_s22 + $0x68] sm:$0xff]  }
  0x15   : > { %725 = vmatprep.subr.bf16.mxu0 %v809_v6  ;;  %769 = vmatprep.subr.bf16.mxu1 %v809_v6  ;;  %v825_v20 = vld [vmem:[%s901_s22 + $0x30] sm:$0xff]   ;;  %v827_v22 = vld [vmem:[%s901_s22 + $0x38] sm:$0xff]  }
  0x16   : > { %v826_v21 = vld [vmem:[%s901_s22 + $0x70] sm:$0xff]   ;;  %v828_v23 = vld [vmem:[%s901_s22 + $0x78] sm:$0xff]  }
  0x18   : > { %726 = vmatpush3.bf16.msra.mxu0 %v809_v6  ;;  %777 = vmatpush3.bf16.msra.mxu1 %v809_v6 }
  0x19   : > { %727 = vmatprep.subr.bf16.mxu0 %v810_v7  ;;  %770 = vmatprep.subr.bf16.mxu1 %v810_v7 }
  0x1c   : > { %728 = vmatpush3.bf16.msra.mxu0 %v810_v7  ;;  %778 = vmatpush3.bf16.msra.mxu1 %v810_v7 }
  0x1d   : > { %729 = vmatprep.subr.bf16.mxu0 %v811_v8  ;;  %771 = vmatprep.subr.bf16.mxu1 %v811_v8 }
  0x20   : > { %730 = vmatpush3.bf16.msra.mxu0 %v811_v8  ;;  %779 = vmatpush3.bf16.msra.mxu1 %v811_v8 }
  0x21   : > { %731 = vmatprep.subr.bf16.mxu0 %v812_v9  ;;  %772 = vmatprep.subr.bf16.mxu1 %v812_v9 }
  0x24   : > { %732 = vmatpush3.bf16.msra.mxu0 %v812_v9  ;;  %780 = vmatpush3.bf16.msra.mxu1 %v812_v9 }
  0x27   : > { %734 = vmatmul.mubr.bf16.vlgmr.msra.gmra.mrb[0].mxu0 %v815_v10  ;;  %750 = vmatmul.mubr.bf16.vlgmr.msra.gmra.mrb[0].mxu1 %v816_v11 }
  0x28   : > { %737 = vmatprep.mubr.bf16.mxu0 %v817_v12  ;;  %753 = vmatprep.mubr.bf16.mxu1 %v818_v13 }
  0x2f   : > { %738 = vmatmul.mubr.bf16.gmra.mrb[4].mxu0 %v819_v14  ;;  %754 = vmatmul.mubr.bf16.gmra.mrb[4].mxu1 %v820_v15 }
  0x30   : > { %741 = vmatprep.mubr.bf16.mxu0 %v821_v16  ;;  %757 = vmatprep.mubr.bf16.mxu1 %v822_v17 }
  0x37   : > { %742 = vmatmul.mubr.bf16.gmra.mrb[8].mxu0 %v823_v18  ;;  %758 = vmatmul.mubr.bf16.gmra.mrb[8].mxu1 %v824_v19 }
  0x38   : > { %745 = vmatprep.mubr.bf16.mxu0 %v825_v20  ;;  %761 = vmatprep.mubr.bf16.mxu1 %v826_v21 }
  0x3f   : > { %746 = vmatmul.mubr.bf16.gmra.mrb[12].mxu0 %v827_v22  ;;  %762 = vmatmul.mubr.bf16.gmra.mrb[12].mxu1 %v828_v23 }
  0xfa   : > { %v735_v24 = vpop.f32.mrb[0].mxu0  ;;  %v751_v25 = vpop.f32.mrb[0].mxu1 }
  0xfb   : > { %539 = vst [vmem:[%s938_s8 + $0x10] sm:$0xff] %v735_v24  ;;  %555 = vst [vmem:[%s938_s8 + $0x90] sm:$0xff] %v751_v25  ;;  %v410_v26 = vpop.f32.mrb[1].mxu0  ;;  %v474_v27 = vpop.f32.mrb[1].mxu1 }
  0xfc   : > { %537 = vst [vmem:[%s938_s8] sm:$0xff] %v410_v26  ;;  %553 = vst [vmem:[%s938_s8 + $0x80] sm:$0xff] %v474_v27  ;;  %v736_v28 = vpop.f32.mrb[2].mxu0  ;;  %v752_v29 = vpop.f32.mrb[2].mxu1 }
  0xfd   : > { %540 = vst [vmem:[%s938_s8 + $0x18] sm:$0xff] %v736_v28  ;;  %556 = vst [vmem:[%s938_s8 + $0x98] sm:$0xff] %v752_v29  ;;  %v413_v30 = vpop.f32.mrb[3].mxu0  ;;  %v477_v31 = vpop.f32.mrb[3].mxu1 }
  0xfe   : > { %538 = vst [vmem:[%s938_s8 + $0x8] sm:$0xff] %v413_v30  ;;  %554 = vst [vmem:[%s938_s8 + $0x88] sm:$0xff] %v477_v31 }
 0x102   : > { %v739_v32 = vpop.f32.mrb[4].mxu0  ;;  %v755_v33 = vpop.f32.mrb[4].mxu1 }
 0x103   : > { %543 = vst [vmem:[%s938_s8 + $0x30] sm:$0xff] %v739_v32  ;;  %559 = vst [vmem:[%s938_s8 + $0xb0] sm:$0xff] %v755_v33  ;;  %v426_v34 = vpop.f32.mrb[5].mxu0  ;;  %v490_v35 = vpop.f32.mrb[5].mxu1 }
 0x104   : > { %541 = vst [vmem:[%s938_s8 + $0x20] sm:$0xff] %v426_v34  ;;  %557 = vst [vmem:[%s938_s8 + $0xa0] sm:$0xff] %v490_v35  ;;  %v740_v36 = vpop.f32.mrb[6].mxu0  ;;  %v756_v37 = vpop.f32.mrb[6].mxu1 }
 0x105   : > { %544 = vst [vmem:[%s938_s8 + $0x38] sm:$0xff] %v740_v36  ;;  %560 = vst [vmem:[%s938_s8 + $0xb8] sm:$0xff] %v756_v37  ;;  %v429_v38 = vpop.f32.mrb[7].mxu0  ;;  %v493_v39 = vpop.f32.mrb[7].mxu1 }
 0x106   : > { %542 = vst [vmem:[%s938_s8 + $0x28] sm:$0xff] %v429_v38  ;;  %558 = vst [vmem:[%s938_s8 + $0xa8] sm:$0xff] %v493_v39 }
 0x10a   : > { %v743_v40 = vpop.f32.mrb[8].mxu0  ;;  %v759_v41 = vpop.f32.mrb[8].mxu1 }
 0x10b   : > { %547 = vst [vmem:[%s938_s8 + $0x50] sm:$0xff] %v743_v40  ;;  %563 = vst [vmem:[%s938_s8 + $0xd0] sm:$0xff] %v759_v41  ;;  %v442_v42 = vpop.f32.mrb[9].mxu0  ;;  %v506_v43 = vpop.f32.mrb[9].mxu1 }
 0x10c   : > { %545 = vst [vmem:[%s938_s8 + $0x40] sm:$0xff] %v442_v42  ;;  %561 = vst [vmem:[%s938_s8 + $0xc0] sm:$0xff] %v506_v43  ;;  %v744_v44 = vpop.f32.mrb[10].mxu0  ;;  %v760_v45 = vpop.f32.mrb[10].mxu1 }
 0x10d   : > { %548 = vst [vmem:[%s938_s8 + $0x58] sm:$0xff] %v744_v44  ;;  %564 = vst [vmem:[%s938_s8 + $0xd8] sm:$0xff] %v760_v45  ;;  %v445_v46 = vpop.f32.mrb[11].mxu0  ;;  %v509_v47 = vpop.f32.mrb[11].mxu1 }
 0x10e   : > { %546 = vst [vmem:[%s938_s8 + $0x48] sm:$0xff] %v445_v46  ;;  %562 = vst [vmem:[%s938_s8 + $0xc8] sm:$0xff] %v509_v47 }
 0x112   : > { %v747_v48 = vpop.f32.mrb[12].mxu0  ;;  %v763_v49 = vpop.f32.mrb[12].mxu1 }
 0x113   : > { %551 = vst [vmem:[%s938_s8 + $0x70] sm:$0xff] %v747_v48  ;;  %567 = vst [vmem:[%s938_s8 + $0xf0] sm:$0xff] %v763_v49  ;;  %v458_v50 = vpop.f32.mrb[13].mxu0  ;;  %v522_v51 = vpop.f32.mrb[13].mxu1 }
 0x114   : > { %549 = vst [vmem:[%s938_s8 + $0x60] sm:$0xff] %v458_v50  ;;  %565 = vst [vmem:[%s938_s8 + $0xe0] sm:$0xff] %v522_v51  ;;  %v748_v52 = vpop.f32.mrb[14].mxu0  ;;  %v764_v53 = vpop.f32.mrb[14].mxu1 }
 0x115   : > { %552 = vst [vmem:[%s938_s8 + $0x78] sm:$0xff] %v748_v52  ;;  %568 = vst [vmem:[%s938_s8 + $0xf8] sm:$0xff] %v764_v53  ;;  %v461_v54 = vpop.f32.mrb[15].mxu0  ;;  %v525_v55 = vpop.f32.mrb[15].mxu1 }
 0x116   : > { %550 = vst [vmem:[%s938_s8 + $0x68] sm:$0xff] %v461_v54  ;;  %566 = vst [vmem:[%s938_s8 + $0xe8] sm:$0xff] %v525_v55 }
 0x117 PF: > { %s12_s11 = sadd.s32 1, %s851_s11   ;;  %s984_s9 = smov %s847_s10 }
 0x118   : > { %p9_p5 = scmp.ge.s32.totalorder %s12_s11, 4   ;;  %s985_s10 = smov %s987_s12 }
 0x11a   :  { %11 = sbr.rel (!%p9_p5) target bundleno = 2 (0x2), region = 58 }

</bundles_post_ra>
